<compile_context>
chip_gen: v7x
topology: tpu7x:2x2x1
jax: 0.10.0
libtpu: 0.0.40
codegen_flags: <defaults>
</compile_context>

<pallas_src>
import functools
import math

import jax
import jax.numpy as jnp
from jax import lax
from jax.experimental import pallas as pl
from jax.experimental.pallas import tpu as pltpu


def _round_up(x, m):
    return ((x + m - 1) // m) * m


def _cdiv(a, b):
    return -(-a // b)


def _contrastive_loss_kernel(z_row_ref, z_col_ref, out_ref,
                             denom_sc, pos_sc, *,
                             batch, n_real, inv_t, tile_r, tile_c,
                             col_resident, has_col_pad):
    """One (row-tile, column-tile) step of the 2B x 2B similarity sweep.

    Inputs are already L2-normalized and scaled by sqrt(1/T), so the MXU
    output is the temperature-scaled similarity directly.
    """
    i = pl.program_id(0)
    j = pl.program_id(1)

    @pl.when(j == 0)
    def _init():
        denom_sc[...] = jnp.zeros_like(denom_sc)
        pos_sc[...] = jnp.zeros_like(pos_sc)

    if col_resident:
        # Full z is resident in VMEM; slice the current column tile in place.
        c_start = pl.multiple_of(j * tile_c, tile_c)
        zc = z_col_ref[pl.ds(c_start, tile_c), :]
    else:
        zc = z_col_ref[...]

    # (tile_r, tile_c) temperature-scaled similarity straight off the MXU:
    # contract both operands on their last dim (no transpose pass), f32 acc.
    sim = lax.dot_general(
        z_row_ref[...], zc,
        dimension_numbers=(((1,), (1,)), ((), ())),
        preferred_element_type=jnp.float32)

    r0 = i * tile_r
    c0 = j * tile_c
    r1 = r0 + tile_r
    c1 = c0 + tile_c

    # Scalar tile-overlap predicates: only O(grid_r) of the grid_r*grid_c
    # tiles contain the self-similarity diagonal, a positive pair, or padded
    # columns; everything else takes the fast path below.
    has_diag = jnp.logical_and(r0 < c1, c0 < r1)
    has_pos = jnp.logical_or(
        jnp.logical_and(r0 + batch < c1, c0 < r1 + batch),
        jnp.logical_and(r0 - batch < c1, c0 < r1 - batch))
    special = jnp.logical_or(has_diag, has_pos)
    if has_col_pad:
        special = jnp.logical_or(special, c1 > n_real)

    # Logits are shifted by -1/T (scaled sim <= 1/T) so exp never overflows;
    # exp(1/T) is re-added in log space at finalize time.
    @pl.when(special)
    def _masked():
        row_ids = lax.broadcasted_iota(jnp.int32, (tile_r, 1), 0) + r0
        col_ids = lax.broadcasted_iota(jnp.int32, (1, tile_c), 1) + c0
        is_diag = row_ids == col_ids
        drop = is_diag
        if has_col_pad:
            drop = jnp.logical_or(drop, col_ids >= n_real)
        expl = jnp.where(drop, 0.0, jnp.exp(sim - inv_t))
        denom_sc[...] += jnp.sum(expl, axis=1, keepdims=True)
        partner = row_ids + batch
        partner = jnp.where(partner >= n_real, partner - n_real, partner)
        is_pos = partner == col_ids
        pos_sc[...] += jnp.sum(jnp.where(is_pos, sim, 0.0), axis=1,
                               keepdims=True)

    @pl.when(jnp.logical_not(special))
    def _fast():
        denom_sc[...] += jnp.sum(jnp.exp(sim - inv_t), axis=1, keepdims=True)

    @pl.when(j == pl.num_programs(1) - 1)
    def _finalize():
        # loss_r = -pos_r + log(sum_{k!=r} exp(sim_rk))   (all /T-scaled)
        #        = 1/T - pos_r + log(denom_shifted_r)
        out_ref[...] = inv_t - pos_sc[...] + jnp.log(denom_sc[...])


def _vmem_limit_bytes():
    """~3/4 of physical VMEM, capped at 96 MiB (conservative if unknown)."""
    try:
        cap = int(pltpu.get_tpu_info().vmem_capacity_bytes)
    except Exception:
        cap = 64 * 1024 * 1024  # v7x-sized conservative fallback
    return max(32 * 1024 * 1024, min((cap * 3) // 4, 96 * 1024 * 1024))


def _choose_tiles(n):
    """Row/column tiles and padded row count for the (n, n) similarity."""
    # >= 2 row tiles (v7x megacore), row tiles <= 512.
    grid_r = max(2, _cdiv(n, 512))
    tile_r = _round_up(_cdiv(n, grid_r), 8)
    n_pad = grid_r * tile_r
    # Column tile: largest multiple of tile_r dividing n_pad, capped at 1024.
    tile_c = tile_r
    for k in range(grid_r, 0, -1):
        if grid_r % k == 0 and k * tile_r <= 1024:
            tile_c = k * tile_r
            break
    return tile_r, tile_c, n_pad


def contrastive_loss(proj_1, proj_2, temperature=0.1, use_bf16_matmul=True):
    """proj_1, proj_2: [batch, embedding_dim]. Returns scalar float32 loss."""
    assert proj_1.shape == proj_2.shape and proj_1.ndim == 2
    inv_t = 1.0 / float(temperature)

    batch, dim = proj_1.shape
    n = 2 * batch

    # representations = cat([proj_1, proj_2], dim=0)
    z = jnp.concatenate([proj_1, proj_2], axis=0).astype(jnp.float32)

    # L2-normalize once (F.normalize semantics, eps=1e-12) and fold sqrt(1/T)
    # into the operand so the MXU emits sim/T directly (applied to both
    # operands -> sqrt(1/T)^2 = 1/T, no double counting).
    ssq = jnp.sum(z * z, axis=1, keepdims=True)
    z = z * (lax.rsqrt(jnp.maximum(ssq, jnp.float32(1e-24)))
             * jnp.float32(math.sqrt(inv_t)))

    mxu_dtype = jnp.bfloat16 if use_bf16_matmul else jnp.float32
    z = z.astype(mxu_dtype)

    # Lane-dense embedding dim; rows padded to a tileable size. Zero pad rows
    # stay exactly zero after normalization/scaling above.
    d_pad = max(128, _round_up(dim, 128))
    tile_r, tile_c, n_pad = _choose_tiles(n)
    if n_pad != n or d_pad != dim:
        z = jnp.pad(z, ((0, n_pad - n), (0, d_pad - dim)))

    grid_r = n_pad // tile_r
    grid_c = n_pad // tile_c

    vmem_limit = _vmem_limit_bytes()
    itemsize = jnp.dtype(mxu_dtype).itemsize
    resident_bytes = 2 * n_pad * d_pad * itemsize        # possible double-buffer
    row_stream_bytes = 2 * tile_r * d_pad * itemsize     # double-buffered rows
    sim_bytes = 4 * tile_r * tile_c * 4                  # f32 sim/exp live copies
    col_resident = (resident_bytes + row_stream_bytes + sim_bytes
                    <= int(vmem_limit * 0.8))

    row_spec = pl.BlockSpec((tile_r, d_pad), lambda i, j: (i, 0))
    if col_resident:
        # Full-array block with constant index -> DMA'd once, kept resident.
        col_spec = pl.BlockSpec((n_pad, d_pad), lambda i, j: (0, 0))
    else:
        # Streamed column tiles; deeper pipeline hides DMA for small d_pad.
        col_spec = pl.BlockSpec((tile_c, d_pad), lambda i, j: (j, 0),
                                pipeline_mode=pl.Buffered(3))

    kernel = functools.partial(
        _contrastive_loss_kernel,
        batch=batch, n_real=n, inv_t=inv_t, tile_r=tile_r, tile_c=tile_c,
        col_resident=col_resident, has_col_pad=(n_pad != n))

    row_losses = pl.pallas_call(
        kernel,
        out_shape=jax.ShapeDtypeStruct((n_pad, 1), jnp.float32),
        grid_spec=pltpu.PrefetchScalarGridSpec(
            num_scalar_prefetch=0,
            grid=(grid_r, grid_c),
            in_specs=[row_spec, col_spec],
            out_specs=pl.BlockSpec((tile_r, 1), lambda i, j: (i, 0)),
            scratch_shapes=[
                pltpu.VMEM((tile_r, 1), jnp.float32),   # running denominator
                pltpu.VMEM((tile_r, 1), jnp.float32),   # running positives
            ]),
        compiler_params=pltpu.CompilerParams(
            dimension_semantics=("parallel", "arbitrary"),
            vmem_limit_bytes=vmem_limit),
    )(z, z)

    # Drop pad rows; tiny final reduction (2B scalars) outside the kernel.
    return jnp.sum(row_losses[:n, 0]) / jnp.float32(n)


def _reference_loss(proj_1, proj_2, temperature=0.1):
    # Pure-JAX mirror of the PyTorch module, for sanity checks.
    B = proj_1.shape[0]
    eps = 1e-12
    z_i = proj_1 / jnp.maximum(jnp.linalg.norm(proj_1, axis=1, keepdims=True), eps)
    z_j = proj_2 / jnp.maximum(jnp.linalg.norm(proj_2, axis=1, keepdims=True), eps)
    z = jnp.concatenate([z_i, z_j], axis=0)
    sim = z @ z.T
    sim_ij = jnp.diagonal(sim, offset=B)
    sim_ji = jnp.diagonal(sim, offset=-B)
    positives = jnp.concatenate([sim_ij, sim_ji], axis=0)
    nominator = jnp.exp(positives / temperature)
    mask = (~jnp.eye(2 * B, dtype=bool)).astype(jnp.float32)
    denominator = jnp.sum(mask * jnp.exp(sim / temperature), axis=1)
    all_losses = -jnp.log(nominator / denominator)
    return jnp.sum(all_losses) / (2 * B)


if __name__ == "__main__":
    key = jax.random.PRNGKey(0)
    k1, k2, k3, k4 = jax.random.split(key, 4)

    # Shape implied by the module: [batch, embedding_dim].
    B, D = 8, 32
    p1 = jax.random.normal(k1, (B, D), dtype=jnp.float32)
    p2 = jax.random.normal(k2, (B, D), dtype=jnp.float32)
    ref = _reference_loss(p1, p2, temperature=0.1)

    loss_f32 = jax.block_until_ready(
        contrastive_loss(p1, p2, temperature=0.1, use_bf16_matmul=False))
    assert jnp.allclose(loss_f32, ref, rtol=1e-5, atol=1e-5), (loss_f32, ref)

    loss_bf16 = jax.block_until_ready(contrastive_loss(p1, p2, temperature=0.1))
    assert jnp.allclose(loss_bf16, ref, rtol=5e-2, atol=5e-2), (loss_bf16, ref)

    # Larger case: exercises multiple row tiles + accumulators.
    B2, D2 = 384, 64
    q1 = jax.random.normal(k3, (B2, D2), dtype=jnp.float32)
    q2 = jax.random.normal(k4, (B2, D2), dtype=jnp.float32)
    ref2 = _reference_loss(q1, q2, temperature=0.1)

    loss2_f32 = jax.block_until_ready(
        contrastive_loss(q1, q2, temperature=0.1, use_bf16_matmul=False))
    assert jnp.allclose(loss2_f32, ref2, rtol=1e-4, atol=1e-4), (loss2_f32, ref2)

    loss2_bf16 = jax.block_until_ready(contrastive_loss(q1, q2, temperature=0.1))
    assert jnp.allclose(loss2_bf16, ref2, rtol=5e-2, atol=5e-2), (loss2_bf16, ref2)

    # Awkward batch size: exercises row/column padding + pad-column masking.
    B3, D3 = 13, 40
    r1 = jax.random.normal(k1, (B3, D3), dtype=jnp.float32)
    r2 = jax.random.normal(k2, (B3, D3), dtype=jnp.float32)
    ref3 = _reference_loss(r1, r2, temperature=0.2)
    loss3 = jax.block_until_ready(
        contrastive_loss(r1, r2, temperature=0.2, use_bf16_matmul=False))
    assert jnp.allclose(loss3, ref3, rtol=1e-5, atol=1e-5), (loss3, ref3)

    print("KERNEL_OK")
</pallas_src>

<mosaic_0001>
module attributes {stable_mosaic.version = 11 : i64} {
  func.func @_contrastive_loss_kernel(%arg0: i32, %arg1: i32, %arg2: memref<8x128xf32, #tpu.memory_space<vmem>>, %arg3: memref<16x128xf32, #tpu.memory_space<vmem>>, %arg4: memref<8x1xf32, #tpu.memory_space<vmem>>, %arg5: memref<8x1xf32, #tpu.memory_space<vmem>>, %arg6: memref<8x1xf32, #tpu.memory_space<vmem>>) attributes {dimension_semantics = [#tpu.dimension_semantics<parallel>, #tpu.dimension_semantics<arbitrary>], iteration_bounds = array<i64: 2, 1>, scalar_prefetch = 0 : i64, scratch_operands = 2 : i64, tpu.core_type = #tpu.core_type<tc>, window_params = [{transform_indices = @transform_0, window_bounds = array<i64: 8, 128>}, {pipeline_mode = #tpu.pipeline_mode<synchronous>, transform_indices = @transform_1, window_bounds = array<i64: 16, 128>}, {transform_indices = @transform_2, window_bounds = array<i64: 8, 1>}]} {
    %c0_i32 = arith.constant 0 : i32
    %0 = arith.cmpi eq, %arg1, %c0_i32 : i32
    %1 = arith.extui %0 : i1 to i32
    %c0_i32_0 = arith.constant 0 : i32
    %2 = arith.cmpi ne, %1, %c0_i32_0 : i32
    scf.if %2 {
      %cst_14 = arith.constant 0.000000e+00 : f32
      %36 = vector.broadcast %cst_14 : f32 to vector<8x1xf32>
      %c0_15 = arith.constant 0 : index
      %c0_16 = arith.constant 0 : index
      %37 = vector.load %arg5[%c0_15, %c0_16] : memref<8x1xf32, #tpu.memory_space<vmem>>, vector<8x1xf32>
      tpu.vector_store %arg5[%c0_15, %c0_16], %36 {strides = array<i32>} : memref<8x1xf32, #tpu.memory_space<vmem>>, vector<8x1xf32>,
      %cst_17 = arith.constant 0.000000e+00 : f32
      %38 = vector.broadcast %cst_17 : f32 to vector<8x1xf32>
      %c0_18 = arith.constant 0 : index
      %c0_19 = arith.constant 0 : index
      %39 = vector.load %arg6[%c0_18, %c0_19] : memref<8x1xf32, #tpu.memory_space<vmem>>, vector<8x1xf32>
      tpu.vector_store %arg6[%c0_18, %c0_19], %38 {strides = array<i32>} : memref<8x1xf32, #tpu.memory_space<vmem>>, vector<8x1xf32>,
    } else {
    }
    %c16_i32 = arith.constant 16 : i32
    %3 = arith.muli %arg1, %c16_i32 : i32
    %4 = tpu.assume_multiple %3, 16 : i32
    %5 = arith.index_cast %4 : i32 to index
    %c0 = arith.constant 0 : index
    %6 = vector.load %arg3[%5, %c0] : memref<16x128xf32, #tpu.memory_space<vmem>>, vector<16x128xf32>
    %c0_1 = arith.constant 0 : index
    %c0_2 = arith.constant 0 : index
    %7 = vector.load %arg2[%c0_1, %c0_2] : memref<8x128xf32, #tpu.memory_space<vmem>>, vector<8x128xf32>
    %cst = arith.constant dense<0.000000e+00> : vector<8x16xf32>
    %8 = tpu.matmul %7, %6, %cst {dimension_numbers = #tpu.dot_dimension_numbers<[1], [1], [0], [0], [0, 0, 1, 0], [], []>} : vector<8x128xf32>, vector<16x128xf32>, vector<8x16xf32> -> vector<8x16xf32>
    %c8_i32 = arith.constant 8 : i32
    %9 = arith.muli %arg0, %c8_i32 : i32
    %c16_i32_3 = arith.constant 16 : i32
    %10 = arith.muli %arg1, %c16_i32_3 : i32
    %c8_i32_4 = arith.constant 8 : i32
    %11 = arith.addi %9, %c8_i32_4 : i32
    %c16_i32_5 = arith.constant 16 : i32
    %12 = arith.addi %10, %c16_i32_5 : i32
    %13 = arith.cmpi slt, %9, %12 : i32
    %14 = arith.cmpi slt, %10, %11 : i32
    %15 = arith.andi %13, %14 : i1
    %c8_i32_6 = arith.constant 8 : i32
    %16 = arith.addi %9, %c8_i32_6 : i32
    %17 = arith.cmpi slt, %16, %12 : i32
    %c8_i32_7 = arith.constant 8 : i32
    %18 = arith.addi %11, %c8_i32_7 : i32
    %19 = arith.cmpi slt, %10, %18 : i32
    %20 = arith.andi %17, %19 : i1
    %c8_i32_8 = arith.constant 8 : i32
    %21 = arith.subi %9, %c8_i32_8 : i32
    %22 = arith.cmpi slt, %21, %12 : i32
    %c8_i32_9 = arith.constant 8 : i32
    %23 = arith.subi %11, %c8_i32_9 : i32
    %24 = arith.cmpi slt, %10, %23 : i32
    %25 = arith.andi %22, %24 : i1
    %26 = arith.ori %20, %25 : i1
    %27 = arith.ori %15, %26 : i1
    %28 = arith.extui %27 : i1 to i32
    %c0_i32_10 = arith.constant 0 : i32
    %29 = arith.cmpi ne, %28, %c0_i32_10 : i32
    scf.if %29 {
      %36 = tpu.iota {dimensions = array<i32: 0>} : vector<8x1xi32>
      %37 = vector.broadcast %9 : i32 to vector<8x1xi32>
      %38 = arith.addi %36, %37 : vector<8x1xi32>
      %39 = tpu.iota {dimensions = array<i32: 1>} : vector<1x16xi32>
      %40 = vector.broadcast %10 : i32 to vector<1x16xi32>
      %41 = arith.addi %39, %40 : vector<1x16xi32>
      %42 = vector.broadcast %38 : vector<8x1xi32> to vector<8x16xi32>
      %43 = vector.broadcast %41 : vector<1x16xi32> to vector<8x16xi32>
      %44 = arith.cmpi eq, %42, %43 : vector<8x16xi32>
      %cst_14 = arith.constant 1.000000e+01 : f32
      %45 = vector.broadcast %cst_14 : f32 to vector<8x16xf32>
      %46 = arith.subf %8, %45 : vector<8x16xf32>
      %47 = math.exp %46 : vector<8x16xf32>
      %cst_15 = arith.constant 0.000000e+00 : f32
      %48 = vector.broadcast %cst_15 : f32 to vector<8x16xf32>
      %49 = arith.select %44, %48, %47 : vector<8x16xi1>, vector<8x16xf32>
      %c0_16 = arith.constant 0 : index
      %c0_17 = arith.constant 0 : index
      %50 = vector.load %arg5[%c0_16, %c0_17] : memref<8x1xf32, #tpu.memory_space<vmem>>, vector<8x1xf32>
      %cst_18 = arith.constant dense<0.000000e+00> : vector<8xf32>
      %51 = vector.multi_reduction <add>, %49, %cst_18 [1] : vector<8x16xf32> to vector<8xf32>
      %52 = vector.shape_cast %51 : vector<8xf32> to vector<8x1xf32>
      %53 = arith.addf %50, %52 : vector<8x1xf32>
      %c0_19 = arith.constant 0 : index
      %c0_20 = arith.constant 0 : index
      %54 = vector.load %arg5[%c0_19, %c0_20] : memref<8x1xf32, #tpu.memory_space<vmem>>, vector<8x1xf32>
      tpu.vector_store %arg5[%c0_19, %c0_20], %53 {strides = array<i32>} : memref<8x1xf32, #tpu.memory_space<vmem>>, vector<8x1xf32>,
      %c8_i32_21 = arith.constant 8 : i32
      %55 = vector.broadcast %c8_i32_21 : i32 to vector<8x1xi32>
      %56 = arith.addi %38, %55 : vector<8x1xi32>
      %c16_i32_22 = arith.constant 16 : i32
      %57 = vector.broadcast %c16_i32_22 : i32 to vector<8x1xi32>
      %58 = arith.cmpi sge, %56, %57 : vector<8x1xi32>
      %c16_i32_23 = arith.constant 16 : i32
      %59 = vector.broadcast %c16_i32_23 : i32 to vector<8x1xi32>
      %60 = arith.subi %56, %59 : vector<8x1xi32>
      %61 = arith.select %58, %60, %56 : vector<8x1xi1>, vector<8x1xi32>
      %62 = vector.broadcast %61 : vector<8x1xi32> to vector<8x16xi32>
      %63 = vector.broadcast %41 : vector<1x16xi32> to vector<8x16xi32>
      %64 = arith.cmpi eq, %62, %63 : vector<8x16xi32>
      %c0_24 = arith.constant 0 : index
      %c0_25 = arith.constant 0 : index
      %65 = vector.load %arg6[%c0_24, %c0_25] : memref<8x1xf32, #tpu.memory_space<vmem>>, vector<8x1xf32>
      %cst_26 = arith.constant 0.000000e+00 : f32
      %66 = vector.broadcast %cst_26 : f32 to vector<8x16xf32>
      %67 = arith.select %64, %8, %66 : vector<8x16xi1>, vector<8x16xf32>
      %cst_27 = arith.constant dense<0.000000e+00> : vector<8xf32>
      %68 = vector.multi_reduction <add>, %67, %cst_27 [1] : vector<8x16xf32> to vector<8xf32>
      %69 = vector.shape_cast %68 : vector<8xf32> to vector<8x1xf32>
      %70 = arith.addf %65, %69 : vector<8x1xf32>
      %c0_28 = arith.constant 0 : index
      %c0_29 = arith.constant 0 : index
      %71 = vector.load %arg6[%c0_28, %c0_29] : memref<8x1xf32, #tpu.memory_space<vmem>>, vector<8x1xf32>
      tpu.vector_store %arg6[%c0_28, %c0_29], %70 {strides = array<i32>} : memref<8x1xf32, #tpu.memory_space<vmem>>, vector<8x1xf32>,
    } else {
    }
    %true = arith.constant true
    %30 = arith.xori %27, %true : i1
    %31 = arith.extui %30 : i1 to i32
    %c0_i32_11 = arith.constant 0 : i32
    %32 = arith.cmpi ne, %31, %c0_i32_11 : i32
    scf.if %32 {
      %c0_14 = arith.constant 0 : index
      %c0_15 = arith.constant 0 : index
      %36 = vector.load %arg5[%c0_14, %c0_15] : memref<8x1xf32, #tpu.memory_space<vmem>>, vector<8x1xf32>
      %cst_16 = arith.constant 1.000000e+01 : f32
      %37 = vector.broadcast %cst_16 : f32 to vector<8x16xf32>
      %38 = arith.subf %8, %37 : vector<8x16xf32>
      %39 = math.exp %38 : vector<8x16xf32>
      %cst_17 = arith.constant dense<0.000000e+00> : vector<8xf32>
      %40 = vector.multi_reduction <add>, %39, %cst_17 [1] : vector<8x16xf32> to vector<8xf32>
      %41 = vector.shape_cast %40 : vector<8xf32> to vector<8x1xf32>
      %42 = arith.addf %36, %41 : vector<8x1xf32>
      %c0_18 = arith.constant 0 : index
      %c0_19 = arith.constant 0 : index
      %43 = vector.load %arg5[%c0_18, %c0_19] : memref<8x1xf32, #tpu.memory_space<vmem>>, vector<8x1xf32>
      tpu.vector_store %arg5[%c0_18, %c0_19], %42 {strides = array<i32>} : memref<8x1xf32, #tpu.memory_space<vmem>>, vector<8x1xf32>,
    } else {
    }
    %c0_i32_12 = arith.constant 0 : i32
    %33 = arith.cmpi eq, %arg1, %c0_i32_12 : i32
    %34 = arith.extui %33 : i1 to i32
    %c0_i32_13 = arith.constant 0 : i32
    %35 = arith.cmpi ne, %34, %c0_i32_13 : i32
    scf.if %35 {
      %c0_14 = arith.constant 0 : index
      %c0_15 = arith.constant 0 : index
      %36 = vector.load %arg6[%c0_14, %c0_15] : memref<8x1xf32, #tpu.memory_space<vmem>>, vector<8x1xf32>
      %cst_16 = arith.constant 1.000000e+01 : f32
      %37 = vector.broadcast %cst_16 : f32 to vector<8x1xf32>
      %38 = arith.subf %37, %36 : vector<8x1xf32>
      %c0_17 = arith.constant 0 : index
      %c0_18 = arith.constant 0 : index
      %39 = vector.load %arg5[%c0_17, %c0_18] : memref<8x1xf32, #tpu.memory_space<vmem>>, vector<8x1xf32>
      %40 = math.log %39 : vector<8x1xf32>
      %41 = arith.addf %38, %40 : vector<8x1xf32>
      %c0_19 = arith.constant 0 : index
      %c0_20 = arith.constant 0 : index
      %42 = vector.load %arg4[%c0_19, %c0_20] : memref<8x1xf32, #tpu.memory_space<vmem>>, vector<8x1xf32>
      tpu.vector_store %arg4[%c0_19, %c0_20], %41 {strides = array<i32>} : memref<8x1xf32, #tpu.memory_space<vmem>>, vector<8x1xf32>,
    } else {
    }
    return
  }
  func.func @transform_0(%arg0: i32, %arg1: i32) -> (i32, i32) {
    %c0_i32 = arith.constant 0 : i32
    %c0_i32_0 = arith.constant 0 : i32
    return %arg0, %c0_i32 : i32, i32
  }
  func.func @transform_1(%arg0: i32, %arg1: i32) -> (i32, i32) {
    %c0_i32 = arith.constant 0 : i32
    %c0_i32_0 = arith.constant 0 : i32
    %c0_i32_1 = arith.constant 0 : i32
    return %c0_i32, %c0_i32_0 : i32, i32
  }
  func.func @transform_2(%arg0: i32, %arg1: i32) -> (i32, i32) {
    %c0_i32 = arith.constant 0 : i32
    %c0_i32_0 = arith.constant 0 : i32
    return %arg0, %c0_i32 : i32, i32
  }
}

</mosaic_0001>

<bundles_post_ra>
// kernel: tpu_custom_call.1
= control target key start
LH: loop header
LB: loop body
LE: loop exit
PB: predicated region body
PF: predicated region fallthrough
CT: control target
= control target key end

     0   :  { %7 = vsyncpa [#allocation5], 0  ;;  %s853_s0 = inlined_call_operand.hbm [shape: f32[16,128], index: 0, kind: input, shape index: {}]   ;;  %s854_s1 = inlined_call_operand.hbm [shape: f32[16,128], index: 1, kind: input, shape index: {}]   ;;  %s855_s2 = inlined_call_operand.vmem [shape: f32[16,1], index: 2, kind: output, shape index: {}]  }
   0x1   :  { %9 = vsyncpa [#allocation5 + $0x1], 0 }
   0x2   :  { %10 = vsyncpa [#allocation7], 0  ;;  %s680_s9 = smov 0   ;;  %s682_s10 = smov 0  }
   0x3   :  { %s684_s11 = smov 0   ;;  %s686_s12 = smov 0  }
   0x4   :  { %s688_s13 = smov 0   ;;  %s690_s14 = smov 0  }
   0x5 LB: > { %s433_s15 = sadd.s32 4294967295, %s656_s14   ;;  %p48_p0 = scmp.ne.s32.totalorder %s640_s10, %s636_s9  ;;  %s656_s14 = sphi %s690_s14, %s16_s14   ;;  %s652_s13 = sphi %s688_s13, %s873_s13   ;;  %s648_s12 = sphi %s686_s12, %s872_s12   ;;  %s644_s11 = sphi %s684_s11, %s871_s11   ;;  %s640_s10 = sphi %s682_s10, %s870_s10   ;;  %s636_s9 = sphi %s680_s9, %s869_s9  }
   0x6   : > { %p710_p1 = scmp.eq.s32.totalorder %s433_s15, 0  ;;  %p435_p2 = scmp.ge.s32.totalorder %s656_s14, 1 }
   0x7   : > { %p106_p3 = scmp.lt.s32.totalorder %s656_s14, 3  ;;  %s658_s19 = smov [#allocation6]  }
   0x8   : > { %s860_s16 = scalar_select %p710_p1, 1, 0 }
   0x9   : > { %p718_p4 = por %p710_p1, %p48_p0  ;;  %p722_p5 = pnand %p435_p2, %p106_p3 }
   0xa   : > { %s118_s20 = sshll.u32 %s658_s19, 4  ;;  %s28_s22 = sadd.s32 1, %s652_s13  ;;  %s119_s20 = int_to_ptr.vmem [resolvable:$true] %s118_s20 }
   0xb   : > { %s861_s17 = scalar_select %p718_p4, 1, 0 }
   0xc   : > { %s862_s18 = scalar_select %p722_p5, 1, 0 }
   0xd   : > { %p473_p6 = pneg %p722_p5  ;;  %s544_s25 = scalar_lea.hbm %s854_s1, 256 }
   0xe   : > { %p545_p8 = scmp.ne.s32.totalorder %s854_s1, %s544_s25  ;;  %p551_p12 = scmp.lt.u32.totalorder %s544_s25, %s854_s1 }
   0xf   : > { %p730_p7 = pnand %p473_p6, %p710_p1 }
  0x11   : > { %p546_p9 = pneg %p730_p7 }
  0x13   : > { %p547_p10 = pnand %p546_p9, %p545_p8 }
  0x15   : > { %p548_p11 = pneg %p547_p10 }
  0x17   : > { %p553_p13 = pnand %p551_p12, %p548_p11 }
  0x19   : > { %556 = shalt.err (!%p553_p13)
}
  0x1a   : > { %s557_s30 = scalar_lea.vmem %s119_s20, 256  ;;  %p565_p6 = scmp.lt.s32.totalorder %s119_s20, %s119_s20 }
  0x1b   : > { %p558_p0 = scmp.ne.s32.totalorder %s119_s20, %s557_s30  ;;  %p566_p1 = scmp.lt.s32.totalorder %s557_s30, %s557_s30 }
  0x1d   : > { %p560_p2 = pnand %p558_p0, %p546_p9  ;;  %p567_p4 = por %p566_p1, %p565_p6 }
  0x1f   : > { %p561_p3 = pneg %p560_p2 }
  0x21   : > { %p568_p5 = pnand %p567_p4, %p561_p3 }
  0x23   : > { %571 = shalt.err (!%p568_p5)
}
  0x24   : > { %s659_s3 = smov 128   ;;  %s660_s4 = smov 8  }
  0x25   : > { %476 = dma.hbm_to_vmem [thread:$0]  (!%p730_p7), %s854_s1, 256, %s119_s20, [#allocation7], %s659_s3, %s659_s3, %s660_s4  }
  0x26   : > { %p30_p1 = scmp.ge.s32.totalorder %s28_s22, 2  ;;  %s35_s7 = sadd.s32 1, %s644_s11 }
  0x27   : > { %p42_p4 = scmp.ne.s32.totalorder %s644_s11, %s640_s10  ;;  %p43_p5 = scmp.eq.s32.totalorder %s656_s14, 0 }
  0x28   : > { %s875_s22 = smov (%p30_p1, %s28_s22), 0  ;;  %p482_p9 = scmp.lt.s32.totalorder %s656_s14, 2 }
  0x29   : > { %p44_p8 = por %p43_p5, %p42_p4  ;;  %s32_s8 = ssub.s32 %s652_s13, %s875_s22 }
  0x2a   : > { %s132_s9 = sand.u32 1, %s644_s11   ;;  %p33_p10 = scmp.eq.s32.totalorder %s32_s8, 0 }
  0x2b   : > { %s438_s15 = sshll.u32 %s132_s9, 3  ;;  %s439_s19 = sshll.u32 %s652_s13, 7 }
  0x2c   : > { %s763_s23 = scalar_select %p33_p10, %s644_s11, %s35_s7  }
  0x2d   : > { %s768_s20 = scalar_lea.hbm %s853_s0, %s439_s19  ;;  %s136_s25 = scalar_lea.vmem [#allocation4], %s438_s15 }
  0x2e   : > { %s143_s26 = sshll.u32 %s136_s25, 4  ;;  %p770_p7 = pnand %p482_p9, %p44_p8  ;;  %s774_s26 = int_to_ptr.vmem [resolvable:$true] %s143_s26 }
  0x2f   : > { %s133_s28 = scalar_lea.sflag [#allocation5], %s132_s9  ;;  %s572_s29 = scalar_lea.hbm %s768_s20, 128 }
  0x30   : > { %p573_p11 = scmp.ne.s32.totalorder %s768_s20, %s572_s29  ;;  %p574_p12 = pneg %p770_p7 }
  0x31   : > { %s577_s4 = scalar_lea.hbm %s853_s0, 256  ;;  %p578_p2 = scmp.lt.u32.totalorder %s768_s20, %s853_s0 }
  0x32   : > { %p575_p13 = pnand %p574_p12, %p573_p11  ;;  %p579_p3 = scmp.lt.u32.totalorder %s577_s4, %s572_s29 }
  0x33   : > { %p581_p1 = scmp.lt.u32.totalorder %s572_s29, %s768_s20 }
  0x34   : > { %p576_p0 = pneg %p575_p13  ;;  %p580_p6 = por %p579_p3, %p578_p2 }
  0x36   : > { %p582_p4 = por %p581_p1, %p580_p6 }
  0x38   : > { %p583_p5 = pnand %p582_p4, %p576_p0 }
  0x3a   : > { %586 = shalt.err (!%p583_p5)
}
  0x3b   : > { %s587_s7 = scalar_lea.vmem %s774_s26, 128  ;;  %s661_s8 = smov [#allocation4]  }
  0x3c   : > { %p588_p8 = scmp.ne.s32.totalorder %s774_s26, %s587_s7  ;;  %s592_s9 = sshll.u32 %s661_s8, 4  ;;  %s593_s9 = int_to_ptr.vmem [resolvable:$false] %s592_s9 }
  0x3d   : > { %s594_s15 = scalar_lea.vmem %s593_s9, 256  ;;  %p595_p11 = scmp.lt.s32.totalorder %s774_s26, %s593_s9 }
  0x3e   : > { %p590_p9 = pnand %p588_p8, %p574_p12  ;;  %p596_p13 = scmp.lt.s32.totalorder %s594_s15, %s587_s7 }
  0x40   : > { %p591_p10 = pneg %p590_p9  ;;  %p597_p2 = por %p596_p13, %p595_p11 }
  0x42   : > { %p598_p3 = pnand %p597_p2, %p591_p10 }
  0x44   : > { %601 = shalt.err (!%p598_p3)
}
  0x45   : > { %480 = dma.hbm_to_vmem [thread:$0]  (!%p770_p7), %s768_s20, 128, %s774_s26, %s133_s28  }
  0x46   : > { %p865_p0 = scmp.ne.s32.totalorder %s862_s18, 0 }
  0x47   : > { %s154_s19 = sand.u32 (!%p865_p0), 1, %s640_s10   ;;  %p866_p12 = scmp.ne.s32.totalorder (!%p865_p0), %s861_s17, 0 }
  0x48   : > { %152 = sbr.rel (%p865_p0) target bundleno = 656 (0x290), region = 28  ;;  %s441_s21 = sshll.u32 (!%p865_p0), %s154_s19, 3 }
  0x49   : > { %s155_s24 = scalar_lea.sflag (!%p865_p0), [#allocation5], %s154_s19  ;;  %s158_s25 = scalar_lea.vmem (!%p865_p0), [#allocation4], %s441_s21 }
  0x4f   : > { %627 = dma.done.wait (%p866_p12), %s155_s24, 128  }
  0x50   : > { %629 = vsyncadd (%p866_p12), %s155_s24, 4294967168  ;;  %p867_p6 = scmp.ne.s32.totalorder %s860_s16, 0 }
  0x52   : > { %631 = dma.done.wait (%p867_p6), [#allocation7], 256  }
  0x53   : > { %633 = vsyncadd (%p867_p6), [#allocation7], 4294967040  ;;  %p182_p7 = scmp.lt.s32.totalorder %s648_s12, 1  ;;  %vm190_vm0 = vcmask 7168   ;;  %v662_v0 = vmov 0.0|0.0   ;;  %v663_v1 = vmov 0.0  }
  0x54   : > { %464 = vmatprep.subr.bf16.mxu0 %v662_v0  ;;  %191 = vst.msk [vmem:[#allocation2] sm:$0xff] %vm190_vm0, %v663_v1  ;;  %192 = vst.msk [vmem:[#allocation3] sm:$0xff] %vm190_vm0, %v663_v1  ;;  %vm664_vm1 = vmmov 0   ;;  %v195_v2 = vld [vmem:[#allocation6] sm:$0xff]  ;;  %v196_v3 = vld [vmem:[#allocation6 + $0x8] sm:$0xff]  ;;  %s444_s27 = sshll.u32 %s648_s12, 3 }
  0x55   : > { %s183_s17 = scalar_select %p182_p7, %s648_s12, 1  ;;  %461 = vmatprep.mubr.msk.f32.mxu0 %vm664_vm1, %v663_v1  ;;  %v465_v4 = vpack.c.bf16 %v196_v3, %v195_v2  ;;  %v197_v5 = vld [vmem:[%s158_s25] sm:$0xff] }
  0x56   : > { %s269_s28 = sadd.s32 8, %s444_s27  ;;  %s276_s29 = sadd.s32 16, %s444_s27 }
  0x57   : > { %s443_s18 = sshll.u32 %s183_s17, 3  ;;  %466 = vmatpush3.bf16.xpose.msra.mxu0 %v465_v4  ;;  %p275_p1 = scmp.lt.s32.totalorder %s269_s28, 16 }
  0x58   : > { %s819_s16 = scalar_lea.vmem %s855_s2, %s443_s18  ;;  %p446_p4 = scmp.gt.s32.totalorder %s276_s29, 0 }
  0x59   : > { %s447_s30 = sadd.s32 4294967288, %s444_s27  ;;  %p448_p5 = scmp.gt.s32.totalorder %s444_s27, 0 }
  0x5a   : > { %p271_p8 = scmp.lt.s32.totalorder %s444_s27, 16  ;;  %p445_p9 = scmp.gt.s32.totalorder %s269_s28, 0 }
  0x5b   : > { %p278_p10 = pnand %p446_p4, %p275_p1  ;;  %p281_p11 = scmp.lt.s32.totalorder %s447_s30, 16 }
  0x5c   : > { %p273_p13 = pnand %p445_p9, %p271_p8 }
  0x5d   : > { %p279_p2 = pneg %p278_p10  ;;  %p283_p3 = pnand %p448_p5, %p281_p11 }
  0x5e   : > { %462 = vmatmul.mubr.f32.vlgmr.msra.gmra.mrb[0].mxu0 %v197_v5  ;;  %p274_p0 = pneg %p273_p13 }
  0x5f   : > { %p284_p12 = pneg %p283_p3 }
  0x61   : > { %p285_p6 = por %p284_p12, %p279_p2 }
  0x63   : > { %p822_p7 = por %p285_p6, %p274_p0 }
  0x64   : > { %v290_v8 = vlaneseq (%p822_p7)  ;;  %v292_v10 = vstv (%p822_p7), %s444_s27  ;;  %vm304_vm5 = vcmask (%p822_p7), 130048   ;;  %v303_v23 = vld [vmem:[#allocation2] sm:$0xff] (%p822_p7)  ;;  %v316_v26 = vld [vmem:[#allocation3] sm:$0xff] (%p822_p7) }
  0x66   : > { %v291_v11 = vshrl.u32 (%p822_p7), %v290_v8, 7  ;;  %v295_v15 = vand.u32 (%p822_p7), 127, %v290_v8 }
  0x68   : > { %v293_v13 = vadd.s32 (%p822_p7), %v292_v10, %v291_v11 }
  0x6a   : > { %v311_v14 = vadd.s32 (%p822_p7), 8, %v293_v13  ;;  %vm298_vm3 = vcmp.eq.s32.totalorder (%p822_p7), %v293_v13, %v295_v15 }
  0x6c   : > { %vm312_vm2 = vcmp.ge.s32.totalorder (%p822_p7), %v311_v14, 16  ;;  %v450_v16 = vadd.s32 (%p822_p7), 4294967280, %v311_v14 }
  0x6e   : > { %v314_v17 = vsel (%p822_p7), %vm312_vm2, %v450_v16, %v311_v14 }
  0x6f   : > { %vm315_vm4 = vcmp.eq.s32.totalorder (%p822_p7), %v314_v17, %v295_v15 }
 0x12c   : > { %289 = sbr.rel (!%p822_p7) target bundleno = 472 (0x1d8), region = 44 }
 0x131   : > { %v264_v6 = vpop.f32.mrb[0].mxu0 }
 0x132   : > { %v463_v7 = vpop.f32.mrb[1].mxu0  ;;  %v449_v9 = vadd.f32 (%p822_p7), -10.0, %v264_v6  ;;  %v317_v20 = vsel (%p822_p7), %vm315_vm4, %v264_v6, 0.0 }
 0x133   : > { %v318_v22 = vsel %vm304_vm5, %v317_v20, 0.0 }
 0x134   : > { %v300_v12 = vmul.f32 1.442695, %v449_v9 }
 0x136   : > { %538 = vpow2.f32 %v300_v12 }
 0x140   : > { %v539_v18 = vpop.eup %538 }
 0x141   : > { %v302_v19 = vsel %vm298_vm3, 0.0, %v539_v18 }
 0x142   : > { %v305_v21 = vsel %vm304_vm5, %v302_v19, 0.0 }
 0x143   : > { %306 = vadd.xlane.f32.xlu0 %v305_v21 }
 0x147   : > { %319 = vadd.xlane.f32.xlu0 %v318_v22 }
 0x1d0   : > { %v307_v24 = vpop.xlane.xlu0 %306 }
 0x1d1   : > { %v308_v25 = vadd.f32 %v307_v24, %v303_v23 }
 0x1d3   : > { %310 = vst.msk [vmem:[#allocation2] sm:$0xff] %vm190_vm0, %v308_v25 }
 0x1d4   : > { %v320_v27 = vpop.xlane.xlu0 %319 }
 0x1d5   : > { %v321_v28 = vadd.f32 %v320_v27, %v316_v26 }
 0x1d7   : > { %322 = vst.msk [vmem:[#allocation3] sm:$0xff] %vm190_vm0, %v321_v28 }
 0x1d8 PF: > { %325 = sbr.rel (%p822_p7) target bundleno = 633 (0x279), region = 48  ;;  %v451_v29 = vadd.f32 (!%p822_p7), -10.0, %v264_v6  ;;  %vm330_vm6 = vcmask (!%p822_p7), 130048  }
 0x1da   : > { %v328_v30 = vmul.f32 (!%p822_p7), 1.442695, %v451_v29  ;;  %v326_v33 = vld [vmem:[#allocation2] sm:$0xff] (!%p822_p7) }
 0x1dc   : > { %540 = vpow2.f32 (!%p822_p7), %v328_v30 }
 0x1e6   : > { %v541_v31 = vpop.eup %540 }
 0x1e7   : > { %v331_v32 = vsel %vm330_vm6, %v541_v31, 0.0 }
 0x1e8   : > { %332 = vadd.xlane.f32.xlu0 %v331_v32 }
 0x275   : > { %v333_v34 = vpop.xlane.xlu0 %332 }
 0x276   : > { %v334_v35 = vadd.f32 %v333_v34, %v326_v33 }
 0x278   : > { %336 = vst.msk [vmem:[#allocation2] sm:$0xff] %vm190_vm0, %v334_v35 }
 0x279 PF: > { %v340_v37 = vld [vmem:[#allocation3] sm:$0xff] }
 0x27a   : > { %v341_v38 = vsub.f32 10.0, %v340_v37 }
 0x27f   : > { %v342_v36 = vld [vmem:[#allocation2] sm:$0xff] }
 0x280   : > { %542 = vlog2.f32 %v342_v36 }
 0x28a   : > { %v543_v39 = vpop.eup %542 }
 0x28b   : > { %v344_v40 = vmul.f32 0.6931472, %v543_v39 }
 0x28d   : > { %v345_v41 = vadd.f32 %v344_v40, %v341_v38 }
 0x28f   : > { %347 = vst.msk [vmem:[%s819_s16] sm:$0xff] %vm190_vm0, %v345_v41 }
 0x290 PF: > { %s16_s14 = sadd.s32 1, %s656_s14   ;;  %s869_s9 = smov %s640_s10 }
 0x291   : > { %p13_p1 = scmp.ge.s32.totalorder %s16_s14, 4   ;;  %s870_s10 = smov %s644_s11 }
 0x292   : > { %s871_s11 = smov %s763_s23  ;;  %s872_s12 = smov %s652_s13 }
 0x293   : > { %s873_s13 = smov %s875_s22  ;;  %15 = sbr.rel (!%p13_p1) target bundleno = 5 (0x5), region = 89 }
 0x29a   :  { %367 = vsyncpa [#allocation5], 1 }
 0x29b   :  { %369 = vsyncpa [#allocation5 + $0x1], 1 }
 0x29c   :  { %370 = vsyncpa [#allocation7], 1 }

</bundles_post_ra>
